<compile_context>
chip_gen: v6e
topology: v6e:2x2x1
jax: 0.10.0
libtpu: 0.0.40
codegen_flags: <defaults>
</compile_context>

<pallas_src>
import math
import functools

import jax
import jax.numpy as jnp
from jax.experimental import pallas as pl

E = 32           # embed_dim ("head_size" arg of the torch module)
H = 4            # num_heads
DH = E // H      # per-head dim
L = 8            # target sequence length
S = 8            # source sequence length
B = 2            # batch
DROPOUT_P = 0.5


# --------------------------------------------------------------- fused kernel
def _mha_fused_kernel(q_ref, k_ref, v_ref, w_in_ref, b_in_ref, w_out_t_ref,
                      b_out_ref, u_ref, out_ref, att_ref, *,
                      batch, tgt, src, num_heads, head_dim, scale, drop_p):
    """One pallas_call for the whole forward pass.

    q_ref       : (batch*tgt, E)     rows ordered (b, l)
    k_ref/v_ref : (batch*src, E)     rows ordered (b, s)
    w_in_ref    : (3, H, E, DH)      per-head input-projection W^T blocks
    b_in_ref    : (3, H, 1, DH)      per-head input-projection biases
    w_out_t_ref : (E, E)             out_proj.weight^T (in_features x out_features)
    b_out_ref   : (1, E)
    u_ref       : (batch*tgt, E)     uniform[0,1) numbers for dropout
    out_ref     : (batch*tgt, E)     lane-dense output (heads concatenated on E)
    att_ref     : (batch, tgt, src)  attention weights averaged over heads
    """
    q2 = q_ref[...]
    k2 = k_ref[...]
    v2 = v_ref[...]
    e_dim = q2.shape[1]

    out_acc = jnp.zeros((batch * tgt, e_dim), jnp.float32)
    att_acc = jnp.zeros((batch, tgt, src), jnp.float32)

    # Static (unrolled) loop over heads. Every matmul is a plain (M,K)@(K,N);
    # per-head weight slabs are leading-dim/sublane-aligned slices of the refs.
    for h in range(num_heads):
        qh = jnp.dot(q2, w_in_ref[0, h], preferred_element_type=jnp.float32) + b_in_ref[0, h]
        kh = jnp.dot(k2, w_in_ref[1, h], preferred_element_type=jnp.float32) + b_in_ref[1, h]
        vh = jnp.dot(v2, w_in_ref[2, h], preferred_element_type=jnp.float32) + b_in_ref[2, h]
        qh = qh * scale

        # free leading-dim splits (minor dims unchanged)
        qh3 = qh.reshape(batch, tgt, head_dim)
        kh3 = kh.reshape(batch, src, head_dim)
        vh3 = vh.reshape(batch, src, head_dim)

        s = jnp.einsum("bld,bsd->bls", qh3, kh3, preferred_element_type=jnp.float32)
        m = jnp.max(s, axis=-1, keepdims=True)
        p = jnp.exp(s - m)
        p = p / jnp.sum(p, axis=-1, keepdims=True)
        att_acc = att_acc + p

        oh = jnp.einsum("bls,bsd->bld", p, vh3, preferred_element_type=jnp.float32)
        # out-projection contribution of head h (rows h*DH:(h+1)*DH of W_out^T),
        # so the final store is one lane-dense (batch*tgt, E) slab.
        wo_h = w_out_t_ref[h * head_dim:(h + 1) * head_dim, :]
        out_acc = out_acc + jnp.dot(oh.reshape(batch * tgt, head_dim), wo_h,
                                    preferred_element_type=jnp.float32)

    out = out_acc + b_out_ref[...]

    if drop_p > 0.0:
        # TODO(synk): torch's dropout RNG stream cannot be reproduced bit-exactly;
        # uniforms are generated with jax.random and passed in (pltpu.prng_* has no
        # CPU/interpret lowering, which broke the previous in-kernel PRNG version).
        keep = u_ref[...] >= drop_p
        out = jnp.where(keep, out * (1.0 / (1.0 - drop_p)), 0.0)

    out_ref[...] = out
    att_ref[...] = att_acc * (1.0 / num_heads)


# -------------------------------------------------------------------- wrapper
def multi_head_attention_with_dropout(params, q, k, v, dropout_key, *, training=True):
    Lq, Bq, Eq = q.shape
    Sk = k.shape[0]

    # tiny layout-only glue: batch-major rows so the kernel attends per-batch
    qb = jnp.transpose(q, (1, 0, 2)).reshape(Bq * Lq, Eq)
    kb = jnp.transpose(k, (1, 0, 2)).reshape(Bq * Sk, Eq)
    vb = jnp.transpose(v, (1, 0, 2)).reshape(Bq * Sk, Eq)

    # per-head W^T blocks (one-time, few-KB weight re-layout)
    w_in_heads = params["in_proj_weight"].reshape(3, H, DH, Eq).transpose(0, 1, 3, 2)
    b_in_heads = params["in_proj_bias"].reshape(3, H, 1, DH)
    w_out_t = params["out_proj_weight"].T
    b_out = params["out_proj_bias"].reshape(1, Eq)

    drop_p = DROPOUT_P if training else 0.0
    if training:
        u = jax.random.uniform(dropout_key, (Bq * Lq, Eq), jnp.float32)
    else:
        u = jnp.ones((Bq * Lq, Eq), jnp.float32)

    kernel = functools.partial(
        _mha_fused_kernel,
        batch=Bq, tgt=Lq, src=Sk, num_heads=H, head_dim=DH,
        scale=1.0 / math.sqrt(DH), drop_p=drop_p)

    out2, att = pl.pallas_call(
        kernel,
        out_shape=(
            jax.ShapeDtypeStruct((Bq * Lq, Eq), jnp.float32),
            jax.ShapeDtypeStruct((Bq, Lq, Sk), jnp.float32),
        ),
    )(qb, kb, vb, w_in_heads, b_in_heads, w_out_t, b_out, u)

    out = out2.reshape(Bq, Lq, Eq).transpose(1, 0, 2)   # -> (L, B, E)
    return out, att


# ----------------------------------------------------------- pure-JAX reference
def _reference_mha(params, q, k, v):
    Lq, Bq, Eq = q.shape
    Sk = k.shape[0]
    w_in, b_in = params["in_proj_weight"], params["in_proj_bias"]
    qp = q @ w_in[:E].T + b_in[:E]
    kp = k @ w_in[E:2 * E].T + b_in[E:2 * E]
    vp = v @ w_in[2 * E:].T + b_in[2 * E:]

    def heads(x, seq):
        return x.reshape(seq, Bq, H, DH).transpose(1, 2, 0, 3)   # (B, H, seq, DH)

    qh, kh, vh = heads(qp, Lq), heads(kp, Sk), heads(vp, Sk)
    s = jnp.einsum("bhld,bhsd->bhls", qh, kh) / math.sqrt(DH)
    p = jax.nn.softmax(s, axis=-1)
    o = jnp.einsum("bhls,bhsd->bhld", p, vh)
    o = o.transpose(2, 0, 1, 3).reshape(Lq, Bq, Eq)
    o = o @ params["out_proj_weight"].T + params["out_proj_bias"]
    att = p.mean(axis=1)
    return o, att


def init_params():
    kp = jax.random.PRNGKey(42)
    k1, k2, k3, k4 = jax.random.split(kp, 4)
    bound = 1.0 / math.sqrt(E)
    return {
        "in_proj_weight": jax.random.uniform(k1, (3 * E, E), jnp.float32, -bound, bound),
        "in_proj_bias": jax.random.uniform(k2, (3 * E,), jnp.float32, -bound, bound),
        "out_proj_weight": jax.random.uniform(k3, (E, E), jnp.float32, -bound, bound),
        "out_proj_bias": jax.random.uniform(k4, (E,), jnp.float32, -bound, bound),
    }


if __name__ == "__main__":
    key = jax.random.PRNGKey(0)
    kq, kk, kv, kd = jax.random.split(key, 4)
    q = jax.random.normal(kq, (L, B, E), jnp.float32)
    k = jax.random.normal(kk, (S, B, E), jnp.float32)
    v = jax.random.normal(kv, (S, B, E), jnp.float32)
    params = init_params()

    fwd = jax.jit(multi_head_attention_with_dropout, static_argnames=("training",))

    # eval-mode run (dropout off): cross-check against a pure-JAX reference
    out_eval, att = fwd(params, q, k, v, kd, training=False)
    jax.block_until_ready((out_eval, att))
    ref_out, ref_att = _reference_mha(params, q, k, v)
    assert out_eval.shape == (L, B, E), out_eval.shape
    assert att.shape == (B, L, S), att.shape
    assert bool(jnp.allclose(out_eval, ref_out, rtol=2e-2, atol=2e-2))
    assert bool(jnp.allclose(att, ref_att, rtol=2e-2, atol=2e-2))
    assert bool(jnp.allclose(jnp.sum(att, axis=-1), 1.0, atol=1e-3))

    # training-mode run (dropout active, matching the torch module's forward)
    out_train, att_train = fwd(params, q, k, v, kd, training=True)
    jax.block_until_ready((out_train, att_train))
    assert out_train.shape == (L, B, E), out_train.shape
    assert bool(jnp.all(jnp.isfinite(out_train)))
    assert bool(jnp.all(jnp.isfinite(att_train)))

    print("KERNEL_OK")
</pallas_src>

<mosaic_0001>
module attributes {stable_mosaic.version = 11 : i64} {
  func.func @_mha_fused_kernel(%arg0: memref<16x32xf32, #tpu.memory_space<vmem>>, %arg1: memref<16x32xf32, #tpu.memory_space<vmem>>, %arg2: memref<16x32xf32, #tpu.memory_space<vmem>>, %arg3: memref<3x4x32x8xf32, #tpu.memory_space<vmem>>, %arg4: memref<3x4x1x8xf32, #tpu.memory_space<vmem>>, %arg5: memref<32x32xf32, #tpu.memory_space<vmem>>, %arg6: memref<1x32xf32, #tpu.memory_space<vmem>>, %arg7: memref<16x32xf32, #tpu.memory_space<vmem>>, %arg8: memref<16x32xf32, #tpu.memory_space<vmem>>, %arg9: memref<2x8x8xf32, #tpu.memory_space<vmem>>) attributes {dimension_semantics = [], scalar_prefetch = 0 : i64, scratch_operands = 0 : i64, tpu.core_type = #tpu.core_type<tc>} {
    %c0 = arith.constant 0 : index
    %c0_0 = arith.constant 0 : index
    %0 = vector.load %arg0[%c0, %c0_0] : memref<16x32xf32, #tpu.memory_space<vmem>>, vector<16x32xf32>
    %c0_1 = arith.constant 0 : index
    %c0_2 = arith.constant 0 : index
    %1 = vector.load %arg1[%c0_1, %c0_2] : memref<16x32xf32, #tpu.memory_space<vmem>>, vector<16x32xf32>
    %c0_3 = arith.constant 0 : index
    %c0_4 = arith.constant 0 : index
    %2 = vector.load %arg2[%c0_3, %c0_4] : memref<16x32xf32, #tpu.memory_space<vmem>>, vector<16x32xf32>
    %cst = arith.constant 0.000000e+00 : f32
    %3 = vector.broadcast %cst : f32 to vector<16x32xf32>
    %cst_5 = arith.constant 0.000000e+00 : f32
    %4 = vector.broadcast %cst_5 : f32 to vector<2x8x8xf32>
    %c0_6 = arith.constant 0 : index
    %c0_7 = arith.constant 0 : index
    %c0_8 = arith.constant 0 : index
    %c0_9 = arith.constant 0 : index
    %5 = vector.load %arg3[%c0_6, %c0_7, %c0_8, %c0_9] : memref<3x4x32x8xf32, #tpu.memory_space<vmem>>, vector<1x1x32x8xf32>
    %6 = vector.shape_cast %5 : vector<1x1x32x8xf32> to vector<32x8xf32>
    %cst_10 = arith.constant dense<0.000000e+00> : vector<16x8xf32>
    %7 = tpu.matmul %0, %6, %cst_10 {dimension_numbers = #tpu.dot_dimension_numbers<[1], [0], [0], [1], [0, 0, 1, 1], [], []>} : vector<16x32xf32>, vector<32x8xf32>, vector<16x8xf32> -> vector<16x8xf32>
    %c0_11 = arith.constant 0 : index
    %c0_12 = arith.constant 0 : index
    %c0_13 = arith.constant 0 : index
    %c0_14 = arith.constant 0 : index
    %8 = vector.load %arg4[%c0_11, %c0_12, %c0_13, %c0_14] : memref<3x4x1x8xf32, #tpu.memory_space<vmem>>, vector<1x1x1x8xf32>
    %9 = vector.shape_cast %8 : vector<1x1x1x8xf32> to vector<1x8xf32>
    %10 = vector.broadcast %9 : vector<1x8xf32> to vector<16x8xf32>
    %11 = arith.addf %7, %10 : vector<16x8xf32>
    %c1 = arith.constant 1 : index
    %c0_15 = arith.constant 0 : index
    %c0_16 = arith.constant 0 : index
    %c0_17 = arith.constant 0 : index
    %12 = vector.load %arg3[%c1, %c0_15, %c0_16, %c0_17] : memref<3x4x32x8xf32, #tpu.memory_space<vmem>>, vector<1x1x32x8xf32>
    %13 = vector.shape_cast %12 : vector<1x1x32x8xf32> to vector<32x8xf32>
    %cst_18 = arith.constant dense<0.000000e+00> : vector<16x8xf32>
    %14 = tpu.matmul %1, %13, %cst_18 {dimension_numbers = #tpu.dot_dimension_numbers<[1], [0], [0], [1], [0, 0, 1, 1], [], []>} : vector<16x32xf32>, vector<32x8xf32>, vector<16x8xf32> -> vector<16x8xf32>
    %c1_19 = arith.constant 1 : index
    %c0_20 = arith.constant 0 : index
    %c0_21 = arith.constant 0 : index
    %c0_22 = arith.constant 0 : index
    %15 = vector.load %arg4[%c1_19, %c0_20, %c0_21, %c0_22] : memref<3x4x1x8xf32, #tpu.memory_space<vmem>>, vector<1x1x1x8xf32>
    %16 = vector.shape_cast %15 : vector<1x1x1x8xf32> to vector<1x8xf32>
    %17 = vector.broadcast %16 : vector<1x8xf32> to vector<16x8xf32>
    %18 = arith.addf %14, %17 : vector<16x8xf32>
    %c2 = arith.constant 2 : index
    %c0_23 = arith.constant 0 : index
    %c0_24 = arith.constant 0 : index
    %c0_25 = arith.constant 0 : index
    %19 = vector.load %arg3[%c2, %c0_23, %c0_24, %c0_25] : memref<3x4x32x8xf32, #tpu.memory_space<vmem>>, vector<1x1x32x8xf32>
    %20 = vector.shape_cast %19 : vector<1x1x32x8xf32> to vector<32x8xf32>
    %cst_26 = arith.constant dense<0.000000e+00> : vector<16x8xf32>
    %21 = tpu.matmul %2, %20, %cst_26 {dimension_numbers = #tpu.dot_dimension_numbers<[1], [0], [0], [1], [0, 0, 1, 1], [], []>} : vector<16x32xf32>, vector<32x8xf32>, vector<16x8xf32> -> vector<16x8xf32>
    %c2_27 = arith.constant 2 : index
    %c0_28 = arith.constant 0 : index
    %c0_29 = arith.constant 0 : index
    %c0_30 = arith.constant 0 : index
    %22 = vector.load %arg4[%c2_27, %c0_28, %c0_29, %c0_30] : memref<3x4x1x8xf32, #tpu.memory_space<vmem>>, vector<1x1x1x8xf32>
    %23 = vector.shape_cast %22 : vector<1x1x1x8xf32> to vector<1x8xf32>
    %24 = vector.broadcast %23 : vector<1x8xf32> to vector<16x8xf32>
    %25 = arith.addf %21, %24 : vector<16x8xf32>
    %cst_31 = arith.constant 0.353553385 : f32
    %26 = vector.broadcast %cst_31 : f32 to vector<16x8xf32>
    %27 = arith.mulf %11, %26 : vector<16x8xf32>
    %28 = vector.shape_cast %27 : vector<16x8xf32> to vector<2x8x8xf32>
    %29 = vector.shape_cast %18 : vector<16x8xf32> to vector<2x8x8xf32>
    %30 = vector.shape_cast %25 : vector<16x8xf32> to vector<2x8x8xf32>
    "tpu.trace_start"() <{level = 10 : i32, message = "bld,bsd->bls"}> : () -> ()
    %cst_32 = arith.constant dense<0.000000e+00> : vector<2x8x8xf32>
    %31 = tpu.matmul %28, %29, %cst_32 {dimension_numbers = #tpu.dot_dimension_numbers<[2], [2], [1], [1], [0, 0, 0, 1, 1, 1], [0], [0]>} : vector<2x8x8xf32>, vector<2x8x8xf32>, vector<2x8x8xf32> -> vector<2x8x8xf32>
    "tpu.trace_stop"() : () -> ()
    %cst_33 = arith.constant dense<0xFF800000> : vector<2x8xf32>
    %32 = vector.multi_reduction <maximumf>, %31, %cst_33 [2] : vector<2x8x8xf32> to vector<2x8xf32>
    %33 = vector.shape_cast %32 : vector<2x8xf32> to vector<2x8x1xf32>
    %34 = vector.broadcast %33 : vector<2x8x1xf32> to vector<2x8x8xf32>
    %35 = arith.subf %31, %34 : vector<2x8x8xf32>
    %36 = math.exp %35 : vector<2x8x8xf32>
    %cst_34 = arith.constant dense<0.000000e+00> : vector<2x8xf32>
    %37 = vector.multi_reduction <add>, %36, %cst_34 [2] : vector<2x8x8xf32> to vector<2x8xf32>
    %38 = vector.shape_cast %37 : vector<2x8xf32> to vector<2x8x1xf32>
    %39 = vector.broadcast %38 : vector<2x8x1xf32> to vector<2x8x8xf32>
    %40 = arith.divf %36, %39 : vector<2x8x8xf32>
    %41 = arith.addf %4, %40 : vector<2x8x8xf32>
    "tpu.trace_start"() <{level = 10 : i32, message = "bls,bsd->bld"}> : () -> ()
    %cst_35 = arith.constant dense<0.000000e+00> : vector<2x8x8xf32>
    %42 = tpu.matmul %40, %30, %cst_35 {dimension_numbers = #tpu.dot_dimension_numbers<[2], [1], [1], [2], [0, 0, 0, 1, 1, 2], [0], [0]>} : vector<2x8x8xf32>, vector<2x8x8xf32>, vector<2x8x8xf32> -> vector<2x8x8xf32>
    "tpu.trace_stop"() : () -> ()
    %c0_36 = arith.constant 0 : index
    %c0_37 = arith.constant 0 : index
    %43 = vector.load %arg5[%c0_36, %c0_37] : memref<32x32xf32, #tpu.memory_space<vmem>>, vector<8x32xf32>
    %44 = vector.shape_cast %42 : vector<2x8x8xf32> to vector<16x8xf32>
    %cst_38 = arith.constant dense<0.000000e+00> : vector<16x32xf32>
    %45 = tpu.matmul %44, %43, %cst_38 {dimension_numbers = #tpu.dot_dimension_numbers<[1], [0], [0], [1], [0, 0, 1, 1], [], []>} : vector<16x8xf32>, vector<8x32xf32>, vector<16x32xf32> -> vector<16x32xf32>
    %46 = arith.addf %3, %45 : vector<16x32xf32>
    %c0_39 = arith.constant 0 : index
    %c1_40 = arith.constant 1 : index
    %c0_41 = arith.constant 0 : index
    %c0_42 = arith.constant 0 : index
    %47 = vector.load %arg3[%c0_39, %c1_40, %c0_41, %c0_42] : memref<3x4x32x8xf32, #tpu.memory_space<vmem>>, vector<1x1x32x8xf32>
    %48 = vector.shape_cast %47 : vector<1x1x32x8xf32> to vector<32x8xf32>
    %cst_43 = arith.constant dense<0.000000e+00> : vector<16x8xf32>
    %49 = tpu.matmul %0, %48, %cst_43 {dimension_numbers = #tpu.dot_dimension_numbers<[1], [0], [0], [1], [0, 0, 1, 1], [], []>} : vector<16x32xf32>, vector<32x8xf32>, vector<16x8xf32> -> vector<16x8xf32>
    %c0_44 = arith.constant 0 : index
    %c1_45 = arith.constant 1 : index
    %c0_46 = arith.constant 0 : index
    %c0_47 = arith.constant 0 : index
    %50 = vector.load %arg4[%c0_44, %c1_45, %c0_46, %c0_47] : memref<3x4x1x8xf32, #tpu.memory_space<vmem>>, vector<1x1x1x8xf32>
    %51 = vector.shape_cast %50 : vector<1x1x1x8xf32> to vector<1x8xf32>
    %52 = vector.broadcast %51 : vector<1x8xf32> to vector<16x8xf32>
    %53 = arith.addf %49, %52 : vector<16x8xf32>
    %c1_48 = arith.constant 1 : index
    %c1_49 = arith.constant 1 : index
    %c0_50 = arith.constant 0 : index
    %c0_51 = arith.constant 0 : index
    %54 = vector.load %arg3[%c1_48, %c1_49, %c0_50, %c0_51] : memref<3x4x32x8xf32, #tpu.memory_space<vmem>>, vector<1x1x32x8xf32>
    %55 = vector.shape_cast %54 : vector<1x1x32x8xf32> to vector<32x8xf32>
    %cst_52 = arith.constant dense<0.000000e+00> : vector<16x8xf32>
    %56 = tpu.matmul %1, %55, %cst_52 {dimension_numbers = #tpu.dot_dimension_numbers<[1], [0], [0], [1], [0, 0, 1, 1], [], []>} : vector<16x32xf32>, vector<32x8xf32>, vector<16x8xf32> -> vector<16x8xf32>
    %c1_53 = arith.constant 1 : index
    %c1_54 = arith.constant 1 : index
    %c0_55 = arith.constant 0 : index
    %c0_56 = arith.constant 0 : index
    %57 = vector.load %arg4[%c1_53, %c1_54, %c0_55, %c0_56] : memref<3x4x1x8xf32, #tpu.memory_space<vmem>>, vector<1x1x1x8xf32>
    %58 = vector.shape_cast %57 : vector<1x1x1x8xf32> to vector<1x8xf32>
    %59 = vector.broadcast %58 : vector<1x8xf32> to vector<16x8xf32>
    %60 = arith.addf %56, %59 : vector<16x8xf32>
    %c2_57 = arith.constant 2 : index
    %c1_58 = arith.constant 1 : index
    %c0_59 = arith.constant 0 : index
    %c0_60 = arith.constant 0 : index
    %61 = vector.load %arg3[%c2_57, %c1_58, %c0_59, %c0_60] : memref<3x4x32x8xf32, #tpu.memory_space<vmem>>, vector<1x1x32x8xf32>
    %62 = vector.shape_cast %61 : vector<1x1x32x8xf32> to vector<32x8xf32>
    %cst_61 = arith.constant dense<0.000000e+00> : vector<16x8xf32>
    %63 = tpu.matmul %2, %62, %cst_61 {dimension_numbers = #tpu.dot_dimension_numbers<[1], [0], [0], [1], [0, 0, 1, 1], [], []>} : vector<16x32xf32>, vector<32x8xf32>, vector<16x8xf32> -> vector<16x8xf32>
    %c2_62 = arith.constant 2 : index
    %c1_63 = arith.constant 1 : index
    %c0_64 = arith.constant 0 : index
    %c0_65 = arith.constant 0 : index
    %64 = vector.load %arg4[%c2_62, %c1_63, %c0_64, %c0_65] : memref<3x4x1x8xf32, #tpu.memory_space<vmem>>, vector<1x1x1x8xf32>
    %65 = vector.shape_cast %64 : vector<1x1x1x8xf32> to vector<1x8xf32>
    %66 = vector.broadcast %65 : vector<1x8xf32> to vector<16x8xf32>
    %67 = arith.addf %63, %66 : vector<16x8xf32>
    %cst_66 = arith.constant 0.353553385 : f32
    %68 = vector.broadcast %cst_66 : f32 to vector<16x8xf32>
    %69 = arith.mulf %53, %68 : vector<16x8xf32>
    %70 = vector.shape_cast %69 : vector<16x8xf32> to vector<2x8x8xf32>
    %71 = vector.shape_cast %60 : vector<16x8xf32> to vector<2x8x8xf32>
    %72 = vector.shape_cast %67 : vector<16x8xf32> to vector<2x8x8xf32>
    "tpu.trace_start"() <{level = 10 : i32, message = "bld,bsd->bls"}> : () -> ()
    %cst_67 = arith.constant dense<0.000000e+00> : vector<2x8x8xf32>
    %73 = tpu.matmul %70, %71, %cst_67 {dimension_numbers = #tpu.dot_dimension_numbers<[2], [2], [1], [1], [0, 0, 0, 1, 1, 1], [0], [0]>} : vector<2x8x8xf32>, vector<2x8x8xf32>, vector<2x8x8xf32> -> vector<2x8x8xf32>
    "tpu.trace_stop"() : () -> ()
    %cst_68 = arith.constant dense<0xFF800000> : vector<2x8xf32>
    %74 = vector.multi_reduction <maximumf>, %73, %cst_68 [2] : vector<2x8x8xf32> to vector<2x8xf32>
    %75 = vector.shape_cast %74 : vector<2x8xf32> to vector<2x8x1xf32>
    %76 = vector.broadcast %75 : vector<2x8x1xf32> to vector<2x8x8xf32>
    %77 = arith.subf %73, %76 : vector<2x8x8xf32>
    %78 = math.exp %77 : vector<2x8x8xf32>
    %cst_69 = arith.constant dense<0.000000e+00> : vector<2x8xf32>
    %79 = vector.multi_reduction <add>, %78, %cst_69 [2] : vector<2x8x8xf32> to vector<2x8xf32>
    %80 = vector.shape_cast %79 : vector<2x8xf32> to vector<2x8x1xf32>
    %81 = vector.broadcast %80 : vector<2x8x1xf32> to vector<2x8x8xf32>
    %82 = arith.divf %78, %81 : vector<2x8x8xf32>
    %83 = arith.addf %41, %82 : vector<2x8x8xf32>
    "tpu.trace_start"() <{level = 10 : i32, message = "bls,bsd->bld"}> : () -> ()
    %cst_70 = arith.constant dense<0.000000e+00> : vector<2x8x8xf32>
    %84 = tpu.matmul %82, %72, %cst_70 {dimension_numbers = #tpu.dot_dimension_numbers<[2], [1], [1], [2], [0, 0, 0, 1, 1, 2], [0], [0]>} : vector<2x8x8xf32>, vector<2x8x8xf32>, vector<2x8x8xf32> -> vector<2x8x8xf32>
    "tpu.trace_stop"() : () -> ()
    %c8 = arith.constant 8 : index
    %c0_71 = arith.constant 0 : index
    %85 = vector.load %arg5[%c8, %c0_71] : memref<32x32xf32, #tpu.memory_space<vmem>>, vector<8x32xf32>
    %86 = vector.shape_cast %84 : vector<2x8x8xf32> to vector<16x8xf32>
    %cst_72 = arith.constant dense<0.000000e+00> : vector<16x32xf32>
    %87 = tpu.matmul %86, %85, %cst_72 {dimension_numbers = #tpu.dot_dimension_numbers<[1], [0], [0], [1], [0, 0, 1, 1], [], []>} : vector<16x8xf32>, vector<8x32xf32>, vector<16x32xf32> -> vector<16x32xf32>
    %88 = arith.addf %46, %87 : vector<16x32xf32>
    %c0_73 = arith.constant 0 : index
    %c2_74 = arith.constant 2 : index
    %c0_75 = arith.constant 0 : index
    %c0_76 = arith.constant 0 : index
    %89 = vector.load %arg3[%c0_73, %c2_74, %c0_75, %c0_76] : memref<3x4x32x8xf32, #tpu.memory_space<vmem>>, vector<1x1x32x8xf32>
    %90 = vector.shape_cast %89 : vector<1x1x32x8xf32> to vector<32x8xf32>
    %cst_77 = arith.constant dense<0.000000e+00> : vector<16x8xf32>
    %91 = tpu.matmul %0, %90, %cst_77 {dimension_numbers = #tpu.dot_dimension_numbers<[1], [0], [0], [1], [0, 0, 1, 1], [], []>} : vector<16x32xf32>, vector<32x8xf32>, vector<16x8xf32> -> vector<16x8xf32>
    %c0_78 = arith.constant 0 : index
    %c2_79 = arith.constant 2 : index
    %c0_80 = arith.constant 0 : index
    %c0_81 = arith.constant 0 : index
    %92 = vector.load %arg4[%c0_78, %c2_79, %c0_80, %c0_81] : memref<3x4x1x8xf32, #tpu.memory_space<vmem>>, vector<1x1x1x8xf32>
    %93 = vector.shape_cast %92 : vector<1x1x1x8xf32> to vector<1x8xf32>
    %94 = vector.broadcast %93 : vector<1x8xf32> to vector<16x8xf32>
    %95 = arith.addf %91, %94 : vector<16x8xf32>
    %c1_82 = arith.constant 1 : index
    %c2_83 = arith.constant 2 : index
    %c0_84 = arith.constant 0 : index
    %c0_85 = arith.constant 0 : index
    %96 = vector.load %arg3[%c1_82, %c2_83, %c0_84, %c0_85] : memref<3x4x32x8xf32, #tpu.memory_space<vmem>>, vector<1x1x32x8xf32>
    %97 = vector.shape_cast %96 : vector<1x1x32x8xf32> to vector<32x8xf32>
    %cst_86 = arith.constant dense<0.000000e+00> : vector<16x8xf32>
    %98 = tpu.matmul %1, %97, %cst_86 {dimension_numbers = #tpu.dot_dimension_numbers<[1], [0], [0], [1], [0, 0, 1, 1], [], []>} : vector<16x32xf32>, vector<32x8xf32>, vector<16x8xf32> -> vector<16x8xf32>
    %c1_87 = arith.constant 1 : index
    %c2_88 = arith.constant 2 : index
    %c0_89 = arith.constant 0 : index
    %c0_90 = arith.constant 0 : index
    %99 = vector.load %arg4[%c1_87, %c2_88, %c0_89, %c0_90] : memref<3x4x1x8xf32, #tpu.memory_space<vmem>>, vector<1x1x1x8xf32>
    %100 = vector.shape_cast %99 : vector<1x1x1x8xf32> to vector<1x8xf32>
    %101 = vector.broadcast %100 : vector<1x8xf32> to vector<16x8xf32>
    %102 = arith.addf %98, %101 : vector<16x8xf32>
    %c2_91 = arith.constant 2 : index
    %c2_92 = arith.constant 2 : index
    %c0_93 = arith.constant 0 : index
    %c0_94 = arith.constant 0 : index
    %103 = vector.load %arg3[%c2_91, %c2_92, %c0_93, %c0_94] : memref<3x4x32x8xf32, #tpu.memory_space<vmem>>, vector<1x1x32x8xf32>
    %104 = vector.shape_cast %103 : vector<1x1x32x8xf32> to vector<32x8xf32>
    %cst_95 = arith.constant dense<0.000000e+00> : vector<16x8xf32>
    %105 = tpu.matmul %2, %104, %cst_95 {dimension_numbers = #tpu.dot_dimension_numbers<[1], [0], [0], [1], [0, 0, 1, 1], [], []>} : vector<16x32xf32>, vector<32x8xf32>, vector<16x8xf32> -> vector<16x8xf32>
    %c2_96 = arith.constant 2 : index
    %c2_97 = arith.constant 2 : index
    %c0_98 = arith.constant 0 : index
    %c0_99 = arith.constant 0 : index
    %106 = vector.load %arg4[%c2_96, %c2_97, %c0_98, %c0_99] : memref<3x4x1x8xf32, #tpu.memory_space<vmem>>, vector<1x1x1x8xf32>
    %107 = vector.shape_cast %106 : vector<1x1x1x8xf32> to vector<1x8xf32>
    %108 = vector.broadcast %107 : vector<1x8xf32> to vector<16x8xf32>
    %109 = arith.addf %105, %108 : vector<16x8xf32>
    %cst_100 = arith.constant 0.353553385 : f32
    %110 = vector.broadcast %cst_100 : f32 to vector<16x8xf32>
    %111 = arith.mulf %95, %110 : vector<16x8xf32>
    %112 = vector.shape_cast %111 : vector<16x8xf32> to vector<2x8x8xf32>
    %113 = vector.shape_cast %102 : vector<16x8xf32> to vector<2x8x8xf32>
    %114 = vector.shape_cast %109 : vector<16x8xf32> to vector<2x8x8xf32>
    "tpu.trace_start"() <{level = 10 : i32, message = "bld,bsd->bls"}> : () -> ()
    %cst_101 = arith.constant dense<0.000000e+00> : vector<2x8x8xf32>
    %115 = tpu.matmul %112, %113, %cst_101 {dimension_numbers = #tpu.dot_dimension_numbers<[2], [2], [1], [1], [0, 0, 0, 1, 1, 1], [0], [0]>} : vector<2x8x8xf32>, vector<2x8x8xf32>, vector<2x8x8xf32> -> vector<2x8x8xf32>
    "tpu.trace_stop"() : () -> ()
    %cst_102 = arith.constant dense<0xFF800000> : vector<2x8xf32>
    %116 = vector.multi_reduction <maximumf>, %115, %cst_102 [2] : vector<2x8x8xf32> to vector<2x8xf32>
    %117 = vector.shape_cast %116 : vector<2x8xf32> to vector<2x8x1xf32>
    %118 = vector.broadcast %117 : vector<2x8x1xf32> to vector<2x8x8xf32>
    %119 = arith.subf %115, %118 : vector<2x8x8xf32>
    %120 = math.exp %119 : vector<2x8x8xf32>
    %cst_103 = arith.constant dense<0.000000e+00> : vector<2x8xf32>
    %121 = vector.multi_reduction <add>, %120, %cst_103 [2] : vector<2x8x8xf32> to vector<2x8xf32>
    %122 = vector.shape_cast %121 : vector<2x8xf32> to vector<2x8x1xf32>
    %123 = vector.broadcast %122 : vector<2x8x1xf32> to vector<2x8x8xf32>
    %124 = arith.divf %120, %123 : vector<2x8x8xf32>
    %125 = arith.addf %83, %124 : vector<2x8x8xf32>
    "tpu.trace_start"() <{level = 10 : i32, message = "bls,bsd->bld"}> : () -> ()
    %cst_104 = arith.constant dense<0.000000e+00> : vector<2x8x8xf32>
    %126 = tpu.matmul %124, %114, %cst_104 {dimension_numbers = #tpu.dot_dimension_numbers<[2], [1], [1], [2], [0, 0, 0, 1, 1, 2], [0], [0]>} : vector<2x8x8xf32>, vector<2x8x8xf32>, vector<2x8x8xf32> -> vector<2x8x8xf32>
    "tpu.trace_stop"() : () -> ()
    %c16 = arith.constant 16 : index
    %c0_105 = arith.constant 0 : index
    %127 = vector.load %arg5[%c16, %c0_105] : memref<32x32xf32, #tpu.memory_space<vmem>>, vector<8x32xf32>
    %128 = vector.shape_cast %126 : vector<2x8x8xf32> to vector<16x8xf32>
    %cst_106 = arith.constant dense<0.000000e+00> : vector<16x32xf32>
    %129 = tpu.matmul %128, %127, %cst_106 {dimension_numbers = #tpu.dot_dimension_numbers<[1], [0], [0], [1], [0, 0, 1, 1], [], []>} : vector<16x8xf32>, vector<8x32xf32>, vector<16x32xf32> -> vector<16x32xf32>
    %130 = arith.addf %88, %129 : vector<16x32xf32>
    %c0_107 = arith.constant 0 : index
    %c3 = arith.constant 3 : index
    %c0_108 = arith.constant 0 : index
    %c0_109 = arith.constant 0 : index
    %131 = vector.load %arg3[%c0_107, %c3, %c0_108, %c0_109] : memref<3x4x32x8xf32, #tpu.memory_space<vmem>>, vector<1x1x32x8xf32>
    %132 = vector.shape_cast %131 : vector<1x1x32x8xf32> to vector<32x8xf32>
    %cst_110 = arith.constant dense<0.000000e+00> : vector<16x8xf32>
    %133 = tpu.matmul %0, %132, %cst_110 {dimension_numbers = #tpu.dot_dimension_numbers<[1], [0], [0], [1], [0, 0, 1, 1], [], []>} : vector<16x32xf32>, vector<32x8xf32>, vector<16x8xf32> -> vector<16x8xf32>
    %c0_111 = arith.constant 0 : index
    %c3_112 = arith.constant 3 : index
    %c0_113 = arith.constant 0 : index
    %c0_114 = arith.constant 0 : index
    %134 = vector.load %arg4[%c0_111, %c3_112, %c0_113, %c0_114] : memref<3x4x1x8xf32, #tpu.memory_space<vmem>>, vector<1x1x1x8xf32>
    %135 = vector.shape_cast %134 : vector<1x1x1x8xf32> to vector<1x8xf32>
    %136 = vector.broadcast %135 : vector<1x8xf32> to vector<16x8xf32>
    %137 = arith.addf %133, %136 : vector<16x8xf32>
    %c1_115 = arith.constant 1 : index
    %c3_116 = arith.constant 3 : index
    %c0_117 = arith.constant 0 : index
    %c0_118 = arith.constant 0 : index
    %138 = vector.load %arg3[%c1_115, %c3_116, %c0_117, %c0_118] : memref<3x4x32x8xf32, #tpu.memory_space<vmem>>, vector<1x1x32x8xf32>
    %139 = vector.shape_cast %138 : vector<1x1x32x8xf32> to vector<32x8xf32>
    %cst_119 = arith.constant dense<0.000000e+00> : vector<16x8xf32>
    %140 = tpu.matmul %1, %139, %cst_119 {dimension_numbers = #tpu.dot_dimension_numbers<[1], [0], [0], [1], [0, 0, 1, 1], [], []>} : vector<16x32xf32>, vector<32x8xf32>, vector<16x8xf32> -> vector<16x8xf32>
    %c1_120 = arith.constant 1 : index
    %c3_121 = arith.constant 3 : index
    %c0_122 = arith.constant 0 : index
    %c0_123 = arith.constant 0 : index
    %141 = vector.load %arg4[%c1_120, %c3_121, %c0_122, %c0_123] : memref<3x4x1x8xf32, #tpu.memory_space<vmem>>, vector<1x1x1x8xf32>
    %142 = vector.shape_cast %141 : vector<1x1x1x8xf32> to vector<1x8xf32>
    %143 = vector.broadcast %142 : vector<1x8xf32> to vector<16x8xf32>
    %144 = arith.addf %140, %143 : vector<16x8xf32>
    %c2_124 = arith.constant 2 : index
    %c3_125 = arith.constant 3 : index
    %c0_126 = arith.constant 0 : index
    %c0_127 = arith.constant 0 : index
    %145 = vector.load %arg3[%c2_124, %c3_125, %c0_126, %c0_127] : memref<3x4x32x8xf32, #tpu.memory_space<vmem>>, vector<1x1x32x8xf32>
    %146 = vector.shape_cast %145 : vector<1x1x32x8xf32> to vector<32x8xf32>
    %cst_128 = arith.constant dense<0.000000e+00> : vector<16x8xf32>
    %147 = tpu.matmul %2, %146, %cst_128 {dimension_numbers = #tpu.dot_dimension_numbers<[1], [0], [0], [1], [0, 0, 1, 1], [], []>} : vector<16x32xf32>, vector<32x8xf32>, vector<16x8xf32> -> vector<16x8xf32>
    %c2_129 = arith.constant 2 : index
    %c3_130 = arith.constant 3 : index
    %c0_131 = arith.constant 0 : index
    %c0_132 = arith.constant 0 : index
    %148 = vector.load %arg4[%c2_129, %c3_130, %c0_131, %c0_132] : memref<3x4x1x8xf32, #tpu.memory_space<vmem>>, vector<1x1x1x8xf32>
    %149 = vector.shape_cast %148 : vector<1x1x1x8xf32> to vector<1x8xf32>
    %150 = vector.broadcast %149 : vector<1x8xf32> to vector<16x8xf32>
    %151 = arith.addf %147, %150 : vector<16x8xf32>
    %cst_133 = arith.constant 0.353553385 : f32
    %152 = vector.broadcast %cst_133 : f32 to vector<16x8xf32>
    %153 = arith.mulf %137, %152 : vector<16x8xf32>
    %154 = vector.shape_cast %153 : vector<16x8xf32> to vector<2x8x8xf32>
    %155 = vector.shape_cast %144 : vector<16x8xf32> to vector<2x8x8xf32>
    %156 = vector.shape_cast %151 : vector<16x8xf32> to vector<2x8x8xf32>
    "tpu.trace_start"() <{level = 10 : i32, message = "bld,bsd->bls"}> : () -> ()
    %cst_134 = arith.constant dense<0.000000e+00> : vector<2x8x8xf32>
    %157 = tpu.matmul %154, %155, %cst_134 {dimension_numbers = #tpu.dot_dimension_numbers<[2], [2], [1], [1], [0, 0, 0, 1, 1, 1], [0], [0]>} : vector<2x8x8xf32>, vector<2x8x8xf32>, vector<2x8x8xf32> -> vector<2x8x8xf32>
    "tpu.trace_stop"() : () -> ()
    %cst_135 = arith.constant dense<0xFF800000> : vector<2x8xf32>
    %158 = vector.multi_reduction <maximumf>, %157, %cst_135 [2] : vector<2x8x8xf32> to vector<2x8xf32>
    %159 = vector.shape_cast %158 : vector<2x8xf32> to vector<2x8x1xf32>
    %160 = vector.broadcast %159 : vector<2x8x1xf32> to vector<2x8x8xf32>
    %161 = arith.subf %157, %160 : vector<2x8x8xf32>
    %162 = math.exp %161 : vector<2x8x8xf32>
    %cst_136 = arith.constant dense<0.000000e+00> : vector<2x8xf32>
    %163 = vector.multi_reduction <add>, %162, %cst_136 [2] : vector<2x8x8xf32> to vector<2x8xf32>
    %164 = vector.shape_cast %163 : vector<2x8xf32> to vector<2x8x1xf32>
    %165 = vector.broadcast %164 : vector<2x8x1xf32> to vector<2x8x8xf32>
    %166 = arith.divf %162, %165 : vector<2x8x8xf32>
    %167 = arith.addf %125, %166 : vector<2x8x8xf32>
    "tpu.trace_start"() <{level = 10 : i32, message = "bls,bsd->bld"}> : () -> ()
    %cst_137 = arith.constant dense<0.000000e+00> : vector<2x8x8xf32>
    %168 = tpu.matmul %166, %156, %cst_137 {dimension_numbers = #tpu.dot_dimension_numbers<[2], [1], [1], [2], [0, 0, 0, 1, 1, 2], [0], [0]>} : vector<2x8x8xf32>, vector<2x8x8xf32>, vector<2x8x8xf32> -> vector<2x8x8xf32>
    "tpu.trace_stop"() : () -> ()
    %c24 = arith.constant 24 : index
    %c0_138 = arith.constant 0 : index
    %169 = vector.load %arg5[%c24, %c0_138] : memref<32x32xf32, #tpu.memory_space<vmem>>, vector<8x32xf32>
    %170 = vector.shape_cast %168 : vector<2x8x8xf32> to vector<16x8xf32>
    %cst_139 = arith.constant dense<0.000000e+00> : vector<16x32xf32>
    %171 = tpu.matmul %170, %169, %cst_139 {dimension_numbers = #tpu.dot_dimension_numbers<[1], [0], [0], [1], [0, 0, 1, 1], [], []>} : vector<16x8xf32>, vector<8x32xf32>, vector<16x32xf32> -> vector<16x32xf32>
    %172 = arith.addf %130, %171 : vector<16x32xf32>
    %c0_140 = arith.constant 0 : index
    %c0_141 = arith.constant 0 : index
    %173 = vector.load %arg6[%c0_140, %c0_141] : memref<1x32xf32, #tpu.memory_space<vmem>>, vector<1x32xf32>
    %174 = vector.broadcast %173 : vector<1x32xf32> to vector<16x32xf32>
    %175 = arith.addf %172, %174 : vector<16x32xf32>
    %c0_142 = arith.constant 0 : index
    %c0_143 = arith.constant 0 : index
    %176 = vector.load %arg8[%c0_142, %c0_143] : memref<16x32xf32, #tpu.memory_space<vmem>>, vector<16x32xf32>
    tpu.vector_store %arg8[%c0_142, %c0_143], %175 {strides = array<i32>} : memref<16x32xf32, #tpu.memory_space<vmem>>, vector<16x32xf32>,
    %cst_144 = arith.constant 2.500000e-01 : f32
    %177 = vector.broadcast %cst_144 : f32 to vector<2x8x8xf32>
    %178 = arith.mulf %167, %177 : vector<2x8x8xf32>
    %c0_145 = arith.constant 0 : index
    %c0_146 = arith.constant 0 : index
    %c0_147 = arith.constant 0 : index
    %179 = vector.load %arg9[%c0_145, %c0_146, %c0_147] : memref<2x8x8xf32, #tpu.memory_space<vmem>>, vector<2x8x8xf32>
    tpu.vector_store %arg9[%c0_145, %c0_146, %c0_147], %178 {strides = array<i32>} : memref<2x8x8xf32, #tpu.memory_space<vmem>>, vector<2x8x8xf32>,
    return
  }
}

</mosaic_0001>

<bundles_post_ra>
// kernel: multi_head_attention_with_dropout.1
= control target key start
LH: loop header
LB: loop body
LE: loop exit
PB: predicated region body
PF: predicated region fallthrough
CT: control target
= control target key end

     0   :  { %s3789_s0 = inlined_call_operand.vmem [shape: f32[16,32], index: 0, kind: input, shape index: {}]   ;;  %s3790_s1 = inlined_call_operand.vmem [shape: f32[16,32], index: 1, kind: input, shape index: {}]   ;;  %s3791_s2 = inlined_call_operand.vmem [shape: f32[16,32], index: 2, kind: input, shape index: {}]   ;;  %s3792_s3 = inlined_call_operand.vmem [shape: f32[3,4,32,8], index: 3, kind: input, shape index: {}]   ;;  %s3793_s4 = inlined_call_operand.vmem [shape: f32[3,4,1,8], index: 4, kind: input, shape index: {}]   ;;  %s3794_s5 = inlined_call_operand.vmem [shape: f32[32,32], index: 5, kind: input, shape index: {}]   ;;  %s3795_s6 = inlined_call_operand.vmem [shape: f32[1,32], index: 6, kind: input, shape index: {}]   ;;  %s3796_s7 = inlined_call_operand.vmem [shape: f32[16,32], index: 7, kind: input, shape index: {}]   ;;  %s3797_s8 = inlined_call_operand.vmem [shape: f32[16,32], index: 8, kind: output, shape index: {0}]   ;;  %s3798_s9 = inlined_call_operand.hbm [shape: f32[2,8,8], index: 9, kind: output, shape index: {1}]  }
   0x1   :  { %v41_v0 = vld [vmem:[%s3792_s3 + $0x18] sm:$0xff]  ;;  %v40_v2 = vld [vmem:[%s3792_s3 + $0x10] sm:$0xff]  ;;  %v39_v4 = vld [vmem:[%s3792_s3 + $0x8] sm:$0xff] }
   0x2   :  { %v2781_v1 = vld [vmem:[%s3792_s3 + $0x98] sm:$0xff]  ;;  %3015 = vmatprep.subr.mxu0 %v41_v0  ;;  %v2780_v3 = vld [vmem:[%s3792_s3 + $0x90] sm:$0xff]  ;;  %v2779_v5 = vld [vmem:[%s3792_s3 + $0x88] sm:$0xff] }
   0x3   :  { %3026 = vmatprep.subr.mxu1 %v2781_v1  ;;  %3016 = vmatpush3.msra.mxu0 %v41_v0  ;;  %v38_v6 = vld [vmem:[%s3792_s3] sm:$0xff] }
   0x4   :  { %3027 = vmatpush3.msra.mxu1 %v2781_v1  ;;  %3017 = vmatprep.subr.mxu0 %v40_v2  ;;  %v2778_v7 = vld [vmem:[%s3792_s3 + $0x80] sm:$0xff] }
   0x5   :  { %3028 = vmatprep.subr.mxu1 %v2780_v3  ;;  %3018 = vmatpush3.msra.mxu0 %v40_v2 }
   0x6   :  { %3029 = vmatpush3.msra.mxu1 %v2780_v3 }
   0x7   :  { %15 = vsyncpa [#allocation3], 0  ;;  %3019 = vmatprep.subr.mxu0 %v39_v4  ;;  %3030 = vmatprep.subr.mxu1 %v2779_v5  ;;  %v3388_v8 = vld [vmem:[%s3789_s0] sm:$0xff]  ;;  %vm49_vm0 = vcmask 261120   ;;  %v3398_v10 = vld [vmem:[%s3789_s0 + $0x8] sm:$0xff]  ;;  %v3306_v12 = vmov 0.0  }
   0x8   :  { %3020 = vmatpush3.msra.mxu0 %v39_v4  ;;  %3031 = vmatpush3.msra.mxu1 %v2779_v5  ;;  %v3393_v9 = vld [vmem:[%s3790_s1] sm:$0xff]  ;;  %v3403_v11 = vld [vmem:[%s3790_s1 + $0x8] sm:$0xff]  ;;  %vm3307_vm1 = vmmov 0   ;;  %vm321_vm2 = vcmask 64512   ;;  %v2789_v25 = vld [vmem:[%s3792_s3 + $0x118] sm:$0xff]  ;;  %s3308_s22 = smov [#allocation2]  }
   0x9   :  { %3021 = vmatprep.subr.mxu0 %v38_v6  ;;  %3032 = vmatprep.subr.mxu1 %v2778_v7  ;;  %v2775_v14 = vld [vmem:[%s3793_s4] ss:$0 sm:$0xff]  ;;  %v2783_v16 = vld [vmem:[%s3793_s4 + $0x4] ss:$0 sm:$0xff]  ;;  %v2788_v26 = vld [vmem:[%s3792_s3 + $0x110] sm:$0xff]  ;;  %s2762_s23 = sshll.u32 %s3308_s22, 4  ;;  %s2763_s23 = int_to_ptr.vmem [resolvable:$true] %s2762_s23 }
   0xa   :  { %3022 = vmatpush3.msra.mxu0 %v38_v6  ;;  %3023 = vmatprep.mubr.msk.f32.mxu0 %vm49_vm0, %v3388_v8  ;;  %v3441_v27 = vld [vmem:[%s3791_s2] sm:$0xff]  ;;  %v2787_v28 = vld [vmem:[%s3792_s3 + $0x108] sm:$0xff]  ;;  %v2811_v52 = vld [vmem:[%s3792_s3 + $0xb8] sm:$0xff]  ;;  %p3289_p1 = scmp.lt.s32.totalorder %s2763_s23, %s2763_s23 }
   0xb   :  { %3033 = vmatpush3.msra.mxu1 %v2778_v7  ;;  %3034 = vmatprep.mubr.msk.f32.mxu1 %vm49_vm0, %v3393_v9  ;;  %v2786_v29 = vld [vmem:[%s3792_s3 + $0x100] sm:$0xff]  ;;  %v3454_v30 = vld [vmem:[%s3791_s2 + $0x8] sm:$0xff]  ;;  %v2803_v53 = vld [vmem:[%s3792_s3 + $0x38] sm:$0xff]  ;;  %s3284_s2 = scalar_lea.vmem %s2763_s23, 256 }
   0xc   :  { %3024 = vmatmul.mubr.msk.f32.vlgmr.msra.gmra.mxu0 %vm49_vm0, %v3398_v10  ;;  %3035 = vmatmul.mubr.msk.f32.vlgmr.msra.gmra.mxu1 %vm49_vm0, %v3403_v11  ;;  %v2791_v48 = vld [vmem:[%s3793_s4 + $0x8] ss:$0 sm:$0xff]  ;;  %v2810_v58 = vld [vmem:[%s3792_s3 + $0xb0] sm:$0xff]  ;;  %v2808_v63 = vld [vmem:[%s3792_s3 + $0xa0] sm:$0xff]  ;;  %p3285_p0 = scmp.ne.s32.totalorder %s2763_s23, %s3284_s2  ;;  %p3290_p2 = scmp.lt.s32.totalorder %s3284_s2, %s3284_s2 }
   0xd   :  { %3048 = vmatprep.subr.mxu1 %v3306_v12  ;;  %3050 = vmatprep.mubr.msk.f32.mxu1 %vm3307_vm1, %v3306_v12  ;;  %v2809_v60 = vld [vmem:[%s3792_s3 + $0xa8] sm:$0xff]  ;;  %v2802_v62 = vld [vmem:[%s3792_s3 + $0x30] sm:$0xff]  ;;  %v2800_v1 = vld [vmem:[%s3792_s3 + $0x20] sm:$0xff] }
   0xe   :  { %3037 = vmatprep.subr.mxu0 %v2789_v25  ;;  %3045 = vmatprep.mubr.msk.f32.mxu0 %vm49_vm0, %v3441_v27  ;;  %v2801_v0 = vld [vmem:[%s3792_s3 + $0x28] sm:$0xff]  ;;  %v2813_v7 = vld [vmem:[%s3793_s4 + $0x5] ss:$0 sm:$0xff]  ;;  %p3291_p3 = por %p3290_p2, %p3289_p1 }
   0xf   :  { %3038 = vmatpush3.msra.mxu0 %v2789_v25  ;;  %v2817_v25 = vld [vmem:[%s3792_s3 + $0x128] sm:$0xff] }
  0x10   :  { %3039 = vmatprep.subr.mxu0 %v2788_v26  ;;  %p3292_p4 = pnand %p3291_p3, %p3285_p0 }
  0x11   :  { %3040 = vmatpush3.msra.mxu0 %v2788_v26  ;;  %v2816_v26 = vld [vmem:[%s3792_s3 + $0x120] sm:$0xff] }
  0x12   :  { %3041 = vmatprep.subr.mxu0 %v2787_v28 }
  0x13   :  { %3042 = vmatpush3.msra.mxu0 %v2787_v28 }
  0x14   :  { %3043 = vmatprep.subr.mxu0 %v2786_v29 }
  0x15   :  { %3044 = vmatpush3.msra.mxu0 %v2786_v29 }
  0x16   :  { %3046 = vmatmul.mubr.msk.f32.vlgmr.msra.gmra.mxu0 %vm49_vm0, %v3454_v30  ;;  %3058 = vmatprep.subr.mxu0 %v3306_v12 }
  0x17   :  { %3060 = vmatprep.mubr.msk.f32.mxu0 %vm3307_vm1, %v3306_v12 }
  0xcc   :  { %v3025_v13 = vpop.f32.mrf.mxu0  ;;  %v3036_v15 = vpop.f32.mrf.mxu1 }
  0xcd   :  { %v128_v22 = vadd.f32 %v3025_v13, %v2775_v14  ;;  %v222_v23 = vadd.f32 %v3036_v15, %v2783_v16 }
  0xce   :  { %v122_v17 = vpop.f32.mrf.mxu0  ;;  %v216_v18 = vpop.f32.mrf.mxu1 }
  0xcf   :  { %v123_v19 = vadd.f32 %v2775_v14, %v122_v17  ;;  %v217_v20 = vadd.f32 %v2783_v16, %v216_v18  ;;  %v320_v24 = vmul.f32 0.35355338, %v128_v22  ;;  %v2805_v16 = vld [vmem:[%s3793_s4 + $0x1] ss:$0 sm:$0xff] }
  0xd1   :  { %v319_v21 = vmul.f32 0.35355338, %v123_v19  ;;  %3049 = vmatpush3.xpose.msk.msra.mxu1 %vm321_vm2, %v217_v20 }
  0xd2   :  { %3053 = vmatprep.subr.mxu1 %v3306_v12 }
  0xd4   :  { %3051 = vmatmul.mubr.msk.f32.vlgmr.msra.gmra.mxu1 %vm321_vm2, %v319_v21 }
  0xd5   :  { %3054 = vmatpush3.xpose.msk.msra.mxu1 %vm321_vm2, %v222_v23  ;;  %3055 = vmatprep.mubr.msk.f32.mxu1 %vm3307_vm1, %v3306_v12  ;;  %v2819_v23 = vld [vmem:[%s3792_s3 + $0x138] sm:$0xff] }
  0xd6   :  { %3063 = vmatprep.subr.mxu1 %v3306_v12  ;;  %v3047_v47 = vpop.f32.mrf.mxu0 }
  0xd7   :  { %v316_v49 = vadd.f32 %v3047_v47, %v2791_v48 }
  0xd8   :  { %3056 = vmatmul.mubr.msk.f32.vlgmr.msra.gmra.mxu1 %vm321_vm2, %v320_v24  ;;  %v310_v50 = vpop.f32.mrf.mxu0  ;;  %v2818_v24 = vld [vmem:[%s3792_s3 + $0x130] sm:$0xff] }
  0xd9   :  { %3065 = vmatprep.mubr.msk.f32.mxu1 %vm3307_vm1, %v3306_v12  ;;  %v311_v51 = vadd.f32 %v2791_v48, %v310_v50  ;;  %3064 = vmatpush3.msra.mxu1 %v316_v49  ;;  %v644_v50 = vld [vmem:[%s3794_s5] sm:$0xff] }
  0xda   :  { %3079 = vmatprep.subr.mxu1 %v2811_v52 }
  0xdb   :  { %3059 = vmatpush3.msra.mxu0 %v311_v51 }
  0xdc   :  { %3068 = vmatprep.subr.mxu0 %v2803_v53 }
 0x194   :  { %v394_v31 = vpop.f32.mrf.mxu1 }
 0x195   :  { %v474_v36 = vsel %vm321_vm2, %v394_v31, -inf }
 0x196   :  { %v3052_v32 = vpop.f32.mrf.mxu1 }
 0x198   :  { %v470_v33 = vpop.f32.mrf.mxu1 }
 0x199   :  { %v477_v34 = vsel %vm321_vm2, %v470_v33, -inf }
 0x19a   :  { %478 = vmax.xlane.f32.xlu0 %v477_v34  ;;  %v3057_v35 = vpop.f32.mrf.mxu1 }
 0x19e   :  { %475 = vmax.xlane.f32.xlu0 %v474_v36 }
 0x223   :  { %v479_v37 = vpop.xlane.xlu0 %478 }
 0x224   :  { %v481_v38 = vsub.f32 %v470_v33, %v479_v37 }
 0x226   :  { %v484_v39 = vmul.f32 1.442695, %v481_v38 }
 0x227   :  { %v476_v40 = vpop.xlane.xlu0 %475 }
 0x228   :  { %3252 = vpow2.f32 %v484_v39  ;;  %v480_v41 = vsub.f32 %v394_v31, %v476_v40 }
 0x22a   :  { %v482_v42 = vmul.f32 1.442695, %v480_v41 }
 0x22c   :  { %3254 = vpow2.f32 %v482_v42 }
 0x235   :  { %v3253_v43 = vpop.eup %3252 }
 0x236   :  { %v489_v44 = vsel %vm321_vm2, %v3253_v43, 0.0 }
 0x237   :  { %490 = vadd.xlane.f32.xlu1 %v489_v44 }
 0x239   :  { %v3255_v45 = vpop.eup %3254 }
 0x23a   :  { %v486_v46 = vsel %vm321_vm2, %v3255_v45, 0.0 }
 0x23b   :  { %487 = vadd.xlane.f32.xlu1 %v486_v46  ;;  %v2821_v46 = vld [vmem:[%s3793_s4 + $0x9] ss:$0 sm:$0xff] }
 0x2c0   :  { %v491_v54 = vpop.xlane.xlu1 %490 }
 0x2c1   :  { %3256 = vrcp.f32 %v491_v54 }
 0x2c4   :  { %v488_v55 = vpop.xlane.xlu1 %487 }
 0x2c5   :  { %3258 = vrcp.f32 %v488_v55 }
 0x2ce   :  { %v3257_v56 = vpop.eup %3256 }
 0x2cf   :  { %v3474_v57 = vmul.f32 %v3257_v56, %v3253_v43 }
 0x2d1   :  { %3066 = vmatmul.mubr.msk.f32.vlgmr.msra.gmra.mxu1 %vm321_vm2, %v3474_v57 }
 0x2d2   :  { %v3259_v59 = vpop.eup %3258  ;;  %3080 = vmatpush3.msra.mxu1 %v2811_v52  ;;  %3087 = vmatprep.mubr.msk.f32.mxu1 %vm49_vm0, %v3393_v9 }
 0x2d3   :  { %3081 = vmatprep.subr.mxu1 %v2810_v58  ;;  %v3486_v61 = vmul.f32 %v3259_v59, %v3255_v45  ;;  %v2845_v59 = vld [vmem:[%s3792_s3 + $0xd8] sm:$0xff] }
 0x2d4   :  { %3082 = vmatpush3.msra.mxu1 %v2810_v58  ;;  %v1233_v58 = vld [vmem:[%s3794_s5 + $0x8] sm:$0xff] }
 0x2d5   :  { %3061 = vmatmul.mubr.msk.f32.vlgmr.msra.gmra.mxu0 %vm321_vm2, %v3486_v61  ;;  %3083 = vmatprep.subr.mxu1 %v2809_v60 }
 0x2d6   :  { %3069 = vmatpush3.msra.mxu0 %v2803_v53  ;;  %3084 = vmatpush3.msra.mxu1 %v2809_v60  ;;  %v2844_v60 = vld [vmem:[%s3792_s3 + $0xd0] sm:$0xff] }
 0x2d7   :  { %3070 = vmatprep.subr.mxu0 %v2802_v62  ;;  %3085 = vmatprep.subr.mxu1 %v2808_v63 }
 0x2d8   :  { %3071 = vmatpush3.msra.mxu0 %v2802_v62  ;;  %3086 = vmatpush3.msra.mxu1 %v2808_v63  ;;  %v2837_v62 = vld [vmem:[%s3792_s3 + $0x58] sm:$0xff]  ;;  %v2843_v63 = vld [vmem:[%s3792_s3 + $0xc8] sm:$0xff] }
 0x2d9   :  { %3072 = vmatprep.subr.mxu0 %v2801_v0  ;;  %3088 = vmatmul.mubr.msk.f32.vlgmr.msra.gmra.mxu1 %vm49_vm0, %v3403_v11 }
 0x2da   :  { %3073 = vmatpush3.msra.mxu0 %v2801_v0  ;;  %3076 = vmatprep.mubr.msk.f32.mxu0 %vm49_vm0, %v3388_v8  ;;  %v2842_v0 = vld [vmem:[%s3792_s3 + $0xc0] sm:$0xff] }
 0x2db   :  { %3074 = vmatprep.subr.mxu0 %v2800_v1  ;;  %3101 = vmatprep.subr.mxu1 %v3306_v12 }
 0x2dc   :  { %3075 = vmatpush3.msra.mxu0 %v2800_v1  ;;  %3103 = vmatprep.mubr.msk.f32.mxu1 %vm3307_vm1, %v3306_v12 }
 0x2dd   :  { %3077 = vmatmul.mubr.msk.f32.vlgmr.msra.gmra.mxu0 %vm49_vm0, %v3398_v10  ;;  %3090 = vmatprep.subr.mxu0 %v2819_v23 }
 0x2de   :  { %3098 = vmatprep.mubr.msk.f32.mxu0 %vm49_vm0, %v3441_v27  ;;  %3091 = vmatpush3.msra.mxu0 %v2819_v23  ;;  %v2839_v23 = vld [vmem:[%s3793_s4 + $0x2] ss:$0 sm:$0xff] }
 0x2df   :  { %3092 = vmatprep.subr.mxu0 %v2818_v24 }
 0x2e0   :  { %3093 = vmatpush3.msra.mxu0 %v2818_v24 }
 0x2e1   :  { %3094 = vmatprep.subr.mxu0 %v2817_v25 }
 0x2e2   :  { %3095 = vmatpush3.msra.mxu0 %v2817_v25 }
 0x2e3   :  { %3096 = vmatprep.subr.mxu0 %v2816_v26 }
 0x2e4   :  { %3097 = vmatpush3.msra.mxu0 %v2816_v26 }
 0x2e5   :  { %3099 = vmatmul.mubr.msk.f32.vlgmr.msra.gmra.mxu0 %vm49_vm0, %v3454_v30  ;;  %3111 = vmatprep.subr.mxu0 %v3306_v12 }
 0x2e6   :  { %3113 = vmatprep.mubr.msk.f32.mxu0 %vm3307_vm1, %v3306_v12 }
 0x391   :  { %v3513_v2 = vpop.f32.mrf.mxu1 }
 0x393   :  { %v3067_v3 = vpop.f32.mrf.mxu1 }
 0x395   :  { %v3515_v4 = vpop.f32.mrf.mxu0 }
 0x397   :  { %v3062_v5 = vpop.f32.mrf.mxu0 }
 0x399   :  { %v3089_v6 = vpop.f32.mrf.mxu1 }
 0x39a   :  { %v818_v21 = vadd.f32 %v3089_v6, %v2813_v7  ;;  %v2835_v6 = vld [vmem:[%s3792_s3 + $0x48] sm:$0xff] }
 0x39b   :  { %v812_v13 = vpop.f32.mrf.mxu1 }
 0x39c   :  { %v813_v14 = vadd.f32 %v2813_v7, %v812_v13  ;;  %v2834_v7 = vld [vmem:[%s3792_s3 + $0x40] sm:$0xff] }
 0x39d   :  { %v3078_v15 = vpop.f32.mrf.mxu0 }
 0x39e   :  { %3102 = vmatpush3.xpose.msk.msra.mxu1 %vm321_vm2, %v813_v14  ;;  %v730_v19 = vadd.f32 %v3078_v15, %v2805_v16  ;;  %v2847_v15 = vld [vmem:[%s3793_s4 + $0x6] ss:$0 sm:$0xff] }
 0x39f   :  { %v724_v17 = vpop.f32.mrf.mxu0  ;;  %3106 = vmatprep.subr.mxu1 %v3306_v12 }
 0x3a0   :  { %v725_v18 = vadd.f32 %v2805_v16, %v724_v17  ;;  %v910_v22 = vmul.f32 0.35355338, %v730_v19 }
 0x3a2   :  { %v909_v20 = vmul.f32 0.35355338, %v725_v18 }
 0x3a4   :  { %3104 = vmatmul.mubr.msk.f32.vlgmr.msra.gmra.mxu1 %vm321_vm2, %v909_v20 }
 0x3a5   :  { %3107 = vmatpush3.xpose.msk.msra.mxu1 %vm321_vm2, %v818_v21  ;;  %3108 = vmatprep.mubr.msk.f32.mxu1 %vm3307_vm1, %v3306_v12  ;;  %v3100_v45 = vpop.f32.mrf.mxu0 }
 0x3a6   :  { %3116 = vmatprep.subr.mxu1 %v3306_v12  ;;  %v906_v47 = vadd.f32 %v3100_v45, %v2821_v46 }
 0x3a7   :  { %v900_v48 = vpop.f32.mrf.mxu0 }
 0x3a8   :  { %3109 = vmatmul.mubr.msk.f32.vlgmr.msra.gmra.mxu1 %vm321_vm2, %v910_v22  ;;  %v901_v49 = vadd.f32 %v2821_v46, %v900_v48 }
 0x3a9   :  { %3118 = vmatprep.mubr.msk.f32.mxu1 %vm3307_vm1, %v3306_v12  ;;  %3117 = vmatpush3.msra.mxu1 %v906_v47 }
 0x3aa   :  { %3112 = vmatpush3.msra.mxu0 %v901_v49  ;;  %3126 = vmatprep.subr.mxu1 %v644_v50 }
 0x3ab   :  { %3121 = vmatprep.subr.mxu0 %v1233_v58 }
 0x464   :  { %v983_v28 = vpop.f32.mrf.mxu1 }
 0x465   :  { %v1063_v29 = vsel %vm321_vm2, %v983_v28, -inf }
 0x466   :  { %1064 = vmax.xlane.f32.xlu0 %v1063_v29  ;;  %v3105_v31 = vpop.f32.mrf.mxu1 }
 0x467   :  { %v2853_v31 = vld [vmem:[%s3792_s3 + $0x158] sm:$0xff] }
 0x468   :  { %v1059_v32 = vpop.f32.mrf.mxu1 }
 0x469   :  { %v1066_v33 = vsel %vm321_vm2, %v1059_v32, -inf }
 0x46a   :  { %1067 = vmax.xlane.f32.xlu1 %v1066_v33  ;;  %v3110_v34 = vpop.f32.mrf.mxu1  ;;  %v2851_v33 = vld [vmem:[%s3792_s3 + $0x148] sm:$0xff] }
 0x46b   :  { %v2850_v34 = vld [vmem:[%s3792_s3 + $0x140] sm:$0xff] }
 0x4ef   :  { %v1065_v35 = vpop.xlane.xlu0 %1064 }
 0x4f0   :  { %v1069_v36 = vsub.f32 %v983_v28, %v1065_v35 }
 0x4f2   :  { %v1071_v37 = vmul.f32 1.442695, %v1069_v36 }
 0x4f3   :  { %v1068_v38 = vpop.xlane.xlu1 %1067 }
 0x4f4   :  { %3260 = vpow2.f32 %v1071_v37  ;;  %v1070_v39 = vsub.f32 %v1059_v32, %v1068_v38  ;;  %v2852_v32 = vld [vmem:[%s3792_s3 + $0x150] sm:$0xff] }
 0x4f6   :  { %v1073_v40 = vmul.f32 1.442695, %v1070_v39 }
 0x4f8   :  { %3262 = vpow2.f32 %v1073_v40 }
 0x501   :  { %v3261_v41 = vpop.eup %3260 }
 0x502   :  { %v1075_v42 = vsel %vm321_vm2, %v3261_v41, 0.0 }
 0x503   :  { %1076 = vadd.xlane.f32.xlu0 %v1075_v42 }
 0x505   :  { %v3263_v43 = vpop.eup %3262 }
 0x506   :  { %v1078_v44 = vsel %vm321_vm2, %v3263_v43, 0.0 }
 0x507   :  { %1079 = vadd.xlane.f32.xlu1 %v1078_v44 }
 0x58c   :  { %v1077_v51 = vpop.xlane.xlu0 %1076 }
 0x58d   :  { %3264 = vrcp.f32 %v1077_v51 }
 0x590   :  { %v1080_v52 = vpop.xlane.xlu1 %1079 }
 0x591   :  { %3266 = vrcp.f32 %v1080_v52  ;;  %v2855_v52 = vld [vmem:[%s3793_s4 + $0xa] ss:$0 sm:$0xff] }
 0x59a   :  { %v3265_v53 = vpop.eup %3264 }
 0x59b   :  { %v3560_v54 = vmul.f32 %v3265_v53, %v3261_v41 }
 0x59d   :  { %3114 = vmatmul.mubr.msk.f32.vlgmr.msra.gmra.mxu0 %vm321_vm2, %v3560_v54 }
 0x59e   :  { %v3267_v55 = vpop.eup %3266  ;;  %3122 = vmatpush3.msra.mxu0 %v1233_v58 }
 0x59f   :  { %v3564_v56 = vmul.f32 %v3267_v55, %v3263_v43  ;;  %3131 = vmatprep.subr.mxu0 %v2837_v62 }
 0x5a1   :  { %3119 = vmatmul.mubr.msk.f32.vlgmr.msra.gmra.mxu1 %vm321_vm2, %v3564_v56 }
 0x5a2   :  { %3128 = vmatprep.mubr.msk.f32.mxu1 %vm321_vm2, %v3515_v4  ;;  %3127 = vmatpush3.msra.mxu1 %v644_v50  ;;  %v2836_v4 = vld [vmem:[%s3792_s3 + $0x50] sm:$0xff] }
 0x5a3   :  { %3142 = vmatprep.subr.mxu1 %v2845_v59 }
 0x5a5   :  { %3129 = vmatmul.mubr.msk.f32.vlgmr.msra.gmra.mxu1 %vm321_vm2, %v3513_v2 }
 0x5a6   :  { %3150 = vmatprep.mubr.msk.f32.mxu1 %vm49_vm0, %v3393_v9  ;;  %3143 = vmatpush3.msra.mxu1 %v2845_v59 }
 0x5a7   :  { %3144 = vmatprep.subr.mxu1 %v2844_v60 }
 0x5a8   :  { %3145 = vmatpush3.msra.mxu1 %v2844_v60 }
 0x5a9   :  { %3146 = vmatprep.subr.mxu1 %v2843_v63 }
 0x5aa   :  { %3147 = vmatpush3.msra.mxu1 %v2843_v63  ;;  %v1085_v63 = vadd.f32 %v3560_v54, %v3486_v61  ;;  %v1984_v61 = vld [vmem:[%s3794_s5 + $0x10] sm:$0xff]  ;;  %v2869_v54 = vld [vmem:[%s3792_s3 + $0x78] sm:$0xff] }
 0x5ab   :  { %3148 = vmatprep.subr.mxu1 %v2842_v0 }
 0x5ac   :  { %3149 = vmatpush3.msra.mxu1 %v2842_v0 }
 0x5ad   :  { %3151 = vmatmul.mubr.msk.f32.vlgmr.msra.gmra.mxu1 %vm49_vm0, %v3403_v11  ;;  %3164 = vmatprep.subr.mxu1 %v3306_v12 }
 0x5ae   :  { %3166 = vmatprep.mubr.msk.f32.mxu1 %vm3307_vm1, %v3306_v12 }
 0x65d   :  { %v1156_v1 = vpop.f32.mrf.mxu0 }
 0x65e   :  { %3123 = vmatprep.mubr.msk.f32.mxu0 %vm321_vm2, %v1156_v1 }
 0x65f   :  { %v3115_v2 = vpop.f32.mrf.mxu0 }
 0x661   :  { %v1229_v3 = vpop.f32.mrf.mxu1 }
 0x662   :  { %3124 = vmatmul.mubr.msk.f32.vlgmr.msra.gmra.mxu0 %vm321_vm2, %v1229_v3  ;;  %v1086_v3 = vadd.f32 %v3564_v56, %v3474_v57  ;;  %v2877_v57 = vld [vmem:[%s3792_s3 + $0xf8] sm:$0xff]  ;;  %v2867_v56 = vld [vmem:[%s3792_s3 + $0x68] sm:$0xff] }
 0x663   :  { %3132 = vmatpush3.msra.mxu0 %v2837_v62  ;;  %v3120_v5 = vpop.f32.mrf.mxu1  ;;  %3139 = vmatprep.mubr.msk.f32.mxu0 %vm49_vm0, %v3388_v8 }
 0x664   :  { %3133 = vmatprep.subr.mxu0 %v2836_v4 }
 0x665   :  { %3134 = vmatpush3.msra.mxu0 %v2836_v4  ;;  %v3614_v13 = vpop.f32.mrf.mxu1 }
 0x666   :  { %3135 = vmatprep.subr.mxu0 %v2835_v6 }
 0x667   :  { %3136 = vmatpush3.msra.mxu0 %v2835_v6  ;;  %v3616_v14 = vpop.f32.mrf.mxu1  ;;  %v2866_v6 = vld [vmem:[%s3792_s3 + $0x60] sm:$0xff] }
 0x668   :  { %3137 = vmatprep.subr.mxu0 %v2834_v7 }
 0x669   :  { %3138 = vmatpush3.msra.mxu0 %v2834_v7 }
 0x66a   :  { %3140 = vmatmul.mubr.msk.f32.vlgmr.msra.gmra.mxu0 %vm49_vm0, %v3398_v10  ;;  %3153 = vmatprep.subr.mxu0 %v2853_v31 }
 0x66b   :  { %3161 = vmatprep.mubr.msk.f32.mxu0 %vm49_vm0, %v3441_v27  ;;  %3154 = vmatpush3.msra.mxu0 %v2853_v31 }
 0x66c   :  { %3155 = vmatprep.subr.mxu0 %v2852_v32 }
 0x66d   :  { %v3152_v16 = vpop.f32.mrf.mxu1  ;;  %3156 = vmatpush3.msra.mxu0 %v2852_v32 }
 0x66e   :  { %v1569_v17 = vadd.f32 %v3152_v16, %v2847_v15  ;;  %3157 = vmatprep.subr.mxu0 %v2851_v33 }
 0x66f   :  { %v1563_v18 = vpop.f32.mrf.mxu1  ;;  %3158 = vmatpush3.msra.mxu0 %v2851_v33 }
 0x670   :  { %v1564_v19 = vadd.f32 %v2847_v15, %v1563_v18  ;;  %3159 = vmatprep.subr.mxu0 %v2850_v34 }
 0x671   :  { %3160 = vmatpush3.msra.mxu0 %v2850_v34 }
 0x672   :  { %3165 = vmatpush3.xpose.msk.msra.mxu1 %vm321_vm2, %v1564_v19  ;;  %3162 = vmatmul.mubr.msk.f32.vlgmr.msra.gmra.mxu0 %vm49_vm0, %v3454_v30 }
 0x673   :  { %3169 = vmatprep.subr.mxu1 %v3306_v12  ;;  %3174 = vmatprep.subr.mxu0 %v3306_v12 }
 0x674   :  { %3176 = vmatprep.mubr.msk.f32.mxu0 %vm3307_vm1, %v3306_v12 }
 0x722   :  { %v3623_v20 = vpop.f32.mrf.mxu0 }
 0x724   :  { %v3625_v21 = vpop.f32.mrf.mxu0 }
 0x72a   :  { %v3141_v22 = vpop.f32.mrf.mxu0 }
 0x72b   :  { %v1481_v26 = vadd.f32 %v3141_v22, %v2839_v23  ;;  %v1388_v22 = vadd.f32 %v3616_v14, %v3625_v21 }
 0x72c   :  { %v1475_v24 = vpop.f32.mrf.mxu0 }
 0x72d   :  { %v1476_v25 = vadd.f32 %v2839_v23, %v1475_v24  ;;  %v1661_v29 = vmul.f32 0.35355338, %v1481_v26 }
 0x72f   :  { %v1660_v28 = vmul.f32 0.35355338, %v1476_v25 }
 0x731   :  { %3167 = vmatmul.mubr.msk.f32.vlgmr.msra.gmra.mxu1 %vm321_vm2, %v1660_v28 }
 0x732   :  { %3170 = vmatpush3.xpose.msk.msra.mxu1 %vm321_vm2, %v1569_v17  ;;  %3171 = vmatprep.mubr.msk.f32.mxu1 %vm3307_vm1, %v3306_v12  ;;  %v3163_v51 = vpop.f32.mrf.mxu0  ;;  %v2876_v17 = vld [vmem:[%s3792_s3 + $0xf0] sm:$0xff] }
 0x733   :  { %3179 = vmatprep.subr.mxu1 %v3306_v12  ;;  %v1657_v53 = vadd.f32 %v3163_v51, %v2855_v52 }
 0x734   :  { %v1651_v55 = vpop.f32.mrf.mxu0 }
 0x735   :  { %3172 = vmatmul.mubr.msk.f32.vlgmr.msra.gmra.mxu1 %vm321_vm2, %v1661_v29  ;;  %v1652_v58 = vadd.f32 %v2855_v52, %v1651_v55  ;;  %v2887_v55 = vld [vmem:[%s3793_s4 + $0xb] ss:$0 sm:$0xff] }
 0x736   :  { %3181 = vmatprep.mubr.msk.f32.mxu1 %vm3307_vm1, %v3306_v12  ;;  %3180 = vmatpush3.msra.mxu1 %v1657_v53 }
 0x737   :  { %3175 = vmatpush3.msra.mxu0 %v1652_v58  ;;  %3189 = vmatprep.subr.mxu1 %v2869_v54 }
 0x738   :  { %3184 = vmatprep.subr.mxu0 %v1984_v61 }
 0x7f1   :  { %v1734_v35 = vpop.f32.mrf.mxu1 }
 0x7f2   :  { %v1814_v36 = vsel %vm321_vm2, %v1734_v35, -inf }
 0x7f3   :  { %1815 = vmax.xlane.f32.xlu0 %v1814_v36  ;;  %v3168_v37 = vpop.f32.mrf.mxu1  ;;  %v2884_v36 = vld [vmem:[%s3792_s3 + $0x170] sm:$0xff] }
 0x7f4   :  { %v2883_v37 = vld [vmem:[%s3792_s3 + $0x168] sm:$0xff] }
 0x7f5   :  { %v1810_v38 = vpop.f32.mrf.mxu1 }
 0x7f6   :  { %v1817_v39 = vsel %vm321_vm2, %v1810_v38, -inf }
 0x7f7   :  { %1818 = vmax.xlane.f32.xlu1 %v1817_v39  ;;  %v3173_v40 = vpop.f32.mrf.mxu1 }
 0x87c   :  { %v1816_v41 = vpop.xlane.xlu0 %1815 }
 0x87d   :  { %v1820_v42 = vsub.f32 %v1734_v35, %v1816_v41  ;;  %v2885_v35 = vld [vmem:[%s3792_s3 + $0x178] sm:$0xff] }
 0x87f   :  { %v1822_v43 = vmul.f32 1.442695, %v1820_v42 }
 0x880   :  { %v1819_v44 = vpop.xlane.xlu1 %1818 }
 0x881   :  { %3268 = vpow2.f32 %v1822_v43  ;;  %v1821_v45 = vsub.f32 %v1810_v38, %v1819_v44  ;;  %v2882_v38 = vld [vmem:[%s3792_s3 + $0x160] sm:$0xff] }
 0x883   :  { %v1824_v46 = vmul.f32 1.442695, %v1821_v45 }
 0x885   :  { %3270 = vpow2.f32 %v1824_v46 }
 0x88e   :  { %v3269_v47 = vpop.eup %3268 }
 0x88f   :  { %v1826_v48 = vsel %vm321_vm2, %v3269_v47, 0.0 }
 0x890   :  { %1827 = vadd.xlane.f32.xlu0 %v1826_v48 }
 0x892   :  { %v3271_v49 = vpop.eup %3270 }
 0x893   :  { %v1829_v50 = vsel %vm321_vm2, %v3271_v49, 0.0 }
 0x894   :  { %1830 = vadd.xlane.f32.xlu1 %v1829_v50 }
 0x919   :  { %v1828_v59 = vpop.xlane.xlu0 %1827 }
 0x91a   :  { %3272 = vrcp.f32 %v1828_v59 }
 0x91d   :  { %v1831_v60 = vpop.xlane.xlu1 %1830 }
 0x91e   :  { %3274 = vrcp.f32 %v1831_v60 }
 0x927   :  { %v3273_v62 = vpop.eup %3272 }
 0x928   :  { %v1833_v0 = vmul.f32 %v3273_v62, %v3269_v47 }
 0x92a   :  { %3177 = vmatmul.mubr.msk.f32.vlgmr.msra.gmra.mxu0 %vm321_vm2, %v1833_v0  ;;  %v3665_v1 = vadd.f32 %v1833_v0, %v1085_v63 }
 0x92b   :  { %v3275_v2 = vpop.eup %3274  ;;  %3185 = vmatpush3.msra.mxu0 %v1984_v61 }
 0x92c   :  { %v1835_v4 = vmul.f32 %v3275_v2, %v3271_v49  ;;  %3200 = vmatprep.subr.mxu0 %v2877_v57 }
 0x92e   :  { %3182 = vmatmul.mubr.msk.f32.vlgmr.msra.gmra.mxu1 %vm321_vm2, %v1835_v4  ;;  %v3670_v5 = vadd.f32 %v1835_v4, %v1086_v3 }
 0x92f   :  { %3197 = vmatprep.mubr.msk.f32.mxu1 %vm49_vm0, %v3388_v8  ;;  %3190 = vmatpush3.msra.mxu1 %v2869_v54  ;;  %v2868_v8 = vld [vmem:[%s3792_s3 + $0x70] sm:$0xff] }
 0x930   :  { %3191 = vmatprep.subr.mxu1 %v2868_v8 }
 0x931   :  { %3192 = vmatpush3.msra.mxu1 %v2868_v8 }
 0x932   :  { %3193 = vmatprep.subr.mxu1 %v2867_v56 }
 0x933   :  { %3194 = vmatpush3.msra.mxu1 %v2867_v56  ;;  %v2656_v56 = vld [vmem:[%s3794_s5 + $0x18] sm:$0xff] }
 0x934   :  { %3195 = vmatprep.subr.mxu1 %v2866_v6 }
 0x935   :  { %3196 = vmatpush3.msra.mxu1 %v2866_v6 }
 0x936   :  { %3198 = vmatmul.mubr.msk.f32.vlgmr.msra.gmra.mxu1 %vm49_vm0, %v3398_v10  ;;  %v2875_v10 = vld [vmem:[%s3792_s3 + $0xe8] sm:$0xff]  ;;  %3211 = vmatprep.subr.mxu1 %v2885_v35 }
 0x937   :  { %3219 = vmatprep.mubr.msk.f32.mxu1 %vm49_vm0, %v3441_v27  ;;  %v2874_v27 = vld [vmem:[%s3792_s3 + $0xe0] sm:$0xff]  ;;  %3212 = vmatpush3.msra.mxu1 %v2885_v35 }
 0x938   :  { %3213 = vmatprep.subr.mxu1 %v2884_v36 }
 0x939   :  { %3214 = vmatpush3.msra.mxu1 %v2884_v36 }
 0x93a   :  { %3215 = vmatprep.subr.mxu1 %v2883_v37 }
 0x93b   :  { %3216 = vmatpush3.msra.mxu1 %v2883_v37 }
 0x93c   :  { %3217 = vmatprep.subr.mxu1 %v2882_v38 }
 0x93d   :  { %3218 = vmatpush3.msra.mxu1 %v2882_v38 }
 0x93e   :  { %3220 = vmatmul.mubr.msk.f32.vlgmr.msra.gmra.mxu1 %vm49_vm0, %v3454_v30  ;;  %3232 = vmatprep.subr.mxu1 %v3306_v12 }
 0x93f   :  { %3234 = vmatprep.mubr.msk.f32.mxu1 %vm3307_vm1, %v3306_v12 }
 0x9ea   :  { %v1907_v7 = vpop.f32.mrf.mxu0 }
 0x9eb   :  { %3186 = vmatprep.mubr.msk.f32.mxu0 %vm321_vm2, %v1907_v7 }
 0x9ec   :  { %v3178_v15 = vpop.f32.mrf.mxu0 }
 0x9ee   :  { %v1980_v16 = vpop.f32.mrf.mxu1 }
 0x9ef   :  { %3187 = vmatmul.mubr.msk.f32.vlgmr.msra.gmra.mxu0 %vm321_vm2, %v1980_v16 }
 0x9f0   :  { %3201 = vmatpush3.msra.mxu0 %v2877_v57  ;;  %v3183_v18 = vpop.f32.mrf.mxu1  ;;  %3208 = vmatprep.mubr.msk.f32.mxu0 %vm49_vm0, %v3393_v9  ;;  %v1393_v9 = vadd.f32 %v3614_v13, %v3623_v20  ;;  %v2879_v13 = vld [vmem:[%s3793_s4 + $0x7] ss:$0 sm:$0xff] }
 0x9f1   :  { %3202 = vmatprep.subr.mxu0 %v2876_v17 }
 0x9f2   :  { %3203 = vmatpush3.msra.mxu0 %v2876_v17 }
 0x9f3   :  { %3204 = vmatprep.subr.mxu0 %v2875_v10 }
 0x9f4   :  { %3205 = vmatpush3.msra.mxu0 %v2875_v10 }
 0x9f5   :  { %3206 = vmatprep.subr.mxu0 %v2874_v27 }
 0x9f6   :  { %3207 = vmatpush3.msra.mxu0 %v2874_v27  ;;  %v3199_v26 = vpop.f32.mrf.mxu1 }
 0x9f7   :  { %3209 = vmatmul.mubr.msk.f32.vlgmr.msra.gmra.mxu0 %vm49_vm0, %v3403_v11  ;;  %3222 = vmatprep.subr.mxu0 %v3306_v12  ;;  %v2871_v11 = vld [vmem:[%s3793_s4 + $0x3] ss:$0 sm:$0xff] }
 0x9f8   :  { %3224 = vmatprep.mubr.msk.f32.mxu0 %vm3307_vm1, %v3306_v12  ;;  %v2147_v28 = vpop.f32.mrf.mxu1  ;;  %v2153_v14 = vadd.f32 %v3199_v26, %v2871_v11 }
 0x9f9   :  { %v2148_v20 = vadd.f32 %v2871_v11, %v2147_v28 }
 0x9fa   :  { %v2333_v34 = vmul.f32 0.35355338, %v2153_v14 }
 0x9fb   :  { %v2332_v21 = vmul.f32 0.35355338, %v2148_v20 }
 0x9fe   :  { %v3221_v53 = vpop.f32.mrf.mxu1 }
 0x9ff   :  { %v2329_v58 = vadd.f32 %v3221_v53, %v2887_v55 }
 0xa00   :  { %v2323_v59 = vpop.f32.mrf.mxu1 }
 0xa01   :  { %v2324_v60 = vadd.f32 %v2887_v55, %v2323_v59 }
 0xa03   :  { %3233 = vmatpush3.msra.mxu1 %v2324_v60 }
 0xa04   :  { %3242 = vmatprep.subr.mxu1 %v2656_v56 }
 0xaaf   :  { %v3188_v19 = vpop.f32.mrf.mxu0 }
 0xab0   :  { %v3718_v23 = vadd.f32 %v3188_v19, %v1393_v9 }
 0xab1   :  { %v2057_v24 = vpop.f32.mrf.mxu0 }
 0xab2   :  { %v3720_v25 = vadd.f32 %v2057_v24, %v1388_v22 }
 0xab7   :  { %v3210_v29 = vpop.f32.mrf.mxu0 }
 0xab8   :  { %v2241_v33 = vadd.f32 %v3210_v29, %v2879_v13 }
 0xab9   :  { %v2235_v31 = vpop.f32.mrf.mxu0 }
 0xaba   :  { %v2236_v32 = vadd.f32 %v2879_v13, %v2235_v31 }
 0xabc   :  { %3223 = vmatpush3.xpose.msk.msra.mxu0 %vm321_vm2, %v2236_v32 }
 0xabd   :  { %3227 = vmatprep.subr.mxu0 %v3306_v12 }
 0xabf   :  { %3225 = vmatmul.mubr.msk.f32.vlgmr.msra.gmra.mxu0 %vm321_vm2, %v2332_v21 }
 0xac0   :  { %3228 = vmatpush3.xpose.msk.msra.mxu0 %vm321_vm2, %v2241_v33  ;;  %3229 = vmatprep.mubr.msk.f32.mxu0 %vm3307_vm1, %v3306_v12 }
 0xac1   :  { %3237 = vmatprep.subr.mxu0 %v3306_v12 }
 0xac3   :  { %3230 = vmatmul.mubr.msk.f32.vlgmr.msra.gmra.mxu0 %vm321_vm2, %v2333_v34 }
 0xac4   :  { %3239 = vmatprep.mubr.msk.f32.mxu0 %vm3307_vm1, %v3306_v12  ;;  %3238 = vmatpush3.msra.mxu0 %v2329_v58 }
 0xb7f   :  { %v2406_v39 = vpop.f32.mrf.mxu0 }
 0xb80   :  { %v2486_v40 = vsel %vm321_vm2, %v2406_v39, -inf }
 0xb81   :  { %2487 = vmax.xlane.f32.xlu0 %v2486_v40  ;;  %v3226_v41 = vpop.f32.mrf.mxu0 }
 0xb83   :  { %v2482_v42 = vpop.f32.mrf.mxu0 }
 0xb84   :  { %v2489_v43 = vsel %vm321_vm2, %v2482_v42, -inf }
 0xb85   :  { %2490 = vmax.xlane.f32.xlu1 %v2489_v43  ;;  %v3231_v44 = vpop.f32.mrf.mxu0 }
 0xc0a   :  { %v2488_v45 = vpop.xlane.xlu0 %2487 }
 0xc0b   :  { %v2492_v46 = vsub.f32 %v2406_v39, %v2488_v45 }
 0xc0d   :  { %v2494_v47 = vmul.f32 1.442695, %v2492_v46 }
 0xc0e   :  { %v2491_v48 = vpop.xlane.xlu1 %2490 }
 0xc0f   :  { %3276 = vpow2.f32 %v2494_v47  ;;  %v2493_v30 = vsub.f32 %v2482_v42, %v2491_v48 }
 0xc11   :  { %v2496_v49 = vmul.f32 1.442695, %v2493_v30 }
 0xc13   :  { %3278 = vpow2.f32 %v2496_v49 }
 0xc1c   :  { %v3277_v50 = vpop.eup %3276 }
 0xc1d   :  { %v2498_v12 = vsel %vm321_vm2, %v3277_v50, 0.0 }
 0xc1e   :  { %2499 = vadd.xlane.f32.xlu0 %v2498_v12 }
 0xc20   :  { %v3279_v51 = vpop.eup %3278 }
 0xc21   :  { %v2501_v52 = vsel %vm321_vm2, %v3279_v51, 0.0 }
 0xc22   :  { %2502 = vadd.xlane.f32.xlu1 %v2501_v52 }
 0xca7   :  { %v2500_v62 = vpop.xlane.xlu0 %2499 }
 0xca8   :  { %3280 = vrcp.f32 %v2500_v62 }
 0xcab   :  { %v2503_v63 = vpop.xlane.xlu1 %2502 }
 0xcac   :  { %3282 = vrcp.f32 %v2503_v63 }
 0xcb5   :  { %v3281_v0 = vpop.eup %3280 }
 0xcb6   :  { %v2505_v2 = vmul.f32 %v3281_v0, %v3277_v50 }
 0xcb8   :  { %3235 = vmatmul.mubr.msk.f32.vlgmr.msra.gmra.mxu1 %vm321_vm2, %v2505_v2  ;;  %v2508_v3 = vadd.f32 %v2505_v2, %v3665_v1 }
 0xcb9   :  { %v3283_v4 = vpop.eup %3282  ;;  %3243 = vmatpush3.msra.mxu1 %v2656_v56 }
 0xcba   :  { %v2507_v61 = vmul.f32 %v3283_v4, %v3279_v51  ;;  %v2751_v54 = vmul.f32 0.25, %v2508_v3 }
 0xcbc   :  { %3240 = vmatmul.mubr.msk.f32.vlgmr.msra.gmra.mxu0 %vm321_vm2, %v2507_v61  ;;  %v2509_v57 = vadd.f32 %v2507_v61, %v3670_v5  ;;  %2753 = vst.msk [vmem:[#allocation2] sm:$0xff] %vm321_vm2, %v2751_v54 }
 0xcbe   :  { %v2752_v8 = vmul.f32 0.25, %v2509_v57 }
 0xcc0   :  { %2754 = vst.msk [vmem:[#allocation2 + $0x8] sm:$0xff] %vm321_vm2, %v2752_v8 }
 0xd78   :  { %v2579_v6 = vpop.f32.mrf.mxu1 }
 0xd79   :  { %3244 = vmatprep.mubr.msk.f32.mxu1 %vm321_vm2, %v2579_v6 }
 0xd7a   :  { %v3236_v1 = vpop.f32.mrf.mxu1 }
 0xd7c   :  { %v2652_v7 = vpop.f32.mrf.mxu0 }
 0xd7d   :  { %3245 = vmatmul.mubr.msk.f32.vlgmr.msra.gmra.mxu1 %vm321_vm2, %v2652_v7 }
 0xd7e   :  { %v3241_v15 = vpop.f32.mrf.mxu0 }
 0xd7f   :  { %3295 = shalt.err (!%p3292_p4)
}
 0xd80   :  { %s3309_s5 = smov 128   ;;  %s3310_s24 = smov 8   ;;  %v2898_v16 = vld [vmem:[%s3795_s6] ss:$0 sm:$0xff] }
 0xd81   :  { %2768 = dma.vmem_to_hbm [thread:$0]  %s2763_s23, 256, %s3798_s9, [#allocation3], %s3309_s5, %s3309_s5, %s3310_s24  }
 0xe3d   :  { %v3246_v5 = vpop.f32.mrf.mxu1 }
 0xe3e   :  { %v2739_v17 = vadd.f32 %v3246_v5, %v3718_v23 }
 0xe3f   :  { %v2729_v18 = vpop.f32.mrf.mxu1 }
 0xe40   :  { %v2748_v10 = vadd.f32 %v2898_v16, %v2739_v17  ;;  %v2738_v27 = vadd.f32 %v2729_v18, %v3720_v25 }
 0xe42   :  { %2750 = vst.msk [vmem:[%s3797_s8 + $0x8] sm:$0xff] %vm49_vm0, %v2748_v10  ;;  %v2747_v9 = vadd.f32 %v2898_v16, %v2738_v27 }
 0xe44   :  { %2749 = vst.msk [vmem:[%s3797_s8] sm:$0xff] %vm49_vm0, %v2747_v9 }
 0xe45   :  { %3304 = dma.done.wait [#allocation3], 256  }
 0xe46   :  { %3305 = vsyncadd [#allocation3], 4294967040 }
 0xe47   :  { %2774 = vsyncpa [#allocation3], 1 }

</bundles_post_ra>
